<compile_context>
chip_gen: v6e
topology: v6e:2x2x1
jax: 0.10.0
libtpu: 0.0.40
codegen_flags: <defaults>
</compile_context>

<pallas_src>
import functools

import jax
import jax.numpy as jnp
from jax import lax
from jax.experimental import pallas as pl
from jax.experimental.pallas import tpu as pltpu


def _round_up(x, m):
    return ((x + m - 1) // m) * m


# --------------------------------------------------------------------------
# Pallas kernel: NB batch elements per grid step, channels-on-sublanes /
# padded-frame spatial on lanes.
# --------------------------------------------------------------------------
def _fdm_refine_kernel(x_ref,       # (NB, Cin, Ptot)  bf16 padded activation
                       fdm_ref,     # (NB, Cf,  P_out) f32  fdm, padded-frame layout
                       vmask_ref,   # (1, P_out)       f32  validity mask
                       wf_ref,      # (9, Cout, Cin)   bf16 per-tap 3x3 weights
                       bf_ref,      # (Cout, 1)        f32  conv bias
                       g_ref,       # (Cout, 1)        f32  GN gamma
                       be_ref,      # (Cout, 1)        f32  GN beta
                       wb_ref,      # (Cout, 1)        f32  1x1 conv weight
                       bb_ref,      # (1,)   SMEM      f32  1x1 conv bias
                       fdm_out_ref,  # (NB, Cf, P_out) f32
                       bcg_out_ref,  # (NB, 1,  P_out) f32
                       *, nb, n_valid, taps, off, p_out, hw, cout):
    vmask = vmask_ref[...]                 # (1, P_out)
    bf = bf_ref[...]                       # (Cout, 1)
    gamma = g_ref[...]
    beta = be_ref[...]
    wb = wb_ref[...]
    bb = bb_ref[0]                         # scalar from SMEM

    # Hoist the 9 tiny per-tap weights out of the sample loop.
    w_taps = tuple(wf_ref[t] for t in range(9))       # each (Cout, Cin) bf16

    inv_cnt = 1.0 / float(cout * hw)       # GroupNorm(1) count = C*H*W
    inv_hw = 1.0 / float(hw)               # spatial mean count = H*W
    base = pl.program_id(0) * nb

    def _sample(s, carry):
        @pl.when(base + s < n_valid)       # skip padded batch rows entirely
        def _():
            # ---- 3x3 conv (pad=1): 9 per-tap MXU matmuls over lane-shifted
            # slices of the padded-frame flattened activation (f32 accumulate).
            acc = jnp.zeros((cout, p_out), jnp.float32)
            for t in range(9):
                xt = x_ref[s, :, pl.ds(off + taps[t], p_out)]      # (Cin, P_out) bf16
                acc = acc + jnp.dot(w_taps[t], xt,
                                    preferred_element_type=jnp.float32)
            acc = acc + bf

            # ---- GroupNorm(num_groups=1): two-pass stats over VALID positions
            mean = jnp.sum(acc * vmask) * inv_cnt
            diff = acc - mean
            var = jnp.sum(diff * diff * vmask) * inv_cnt
            y = diff * lax.rsqrt(var + 1e-5) * gamma + beta

            # ---- ReLU ----
            y = jnp.maximum(y, 0.0)

            # ---- 1x1 conv as VPU multiply + channel (sublane) reduce ----
            bcg = jnp.sum(y * wb, axis=0, keepdims=True) + bb      # (1, P_out)
            bcg_out_ref[s] = bcg

            # ---- sigmoid (EUP) -> masked spatial mean -> threshold-gate fdm
            bmap = jax.nn.sigmoid(bcg)
            mean_b = jnp.sum(bmap * vmask) * inv_hw
            fdm_out_ref[s] = jnp.where(bmap > mean_b, fdm_ref[s], 0.0)
        return carry

    lax.fori_loop(0, nb, _sample, 0, unroll=True)


# --------------------------------------------------------------------------
# Wrapper helpers
# --------------------------------------------------------------------------
def _vmem_limit_bytes():
    cap = 128 * 1024 * 1024
    try:
        info = pltpu.get_tpu_info()
        cap = (getattr(info, "vmem_capacity_bytes", None)
               or getattr(info, "vmem_bytes", None) or cap)
    except Exception:
        pass
    # <= ~55% of physical VMEM (v7x: ~35 MiB of 64 MiB), capped at 48 MiB.
    return int(min(48 * 1024 * 1024, int(0.55 * cap)))


def _pick_batch_block(n, cin, ptot, cf, p_out, vmem_limit):
    # Double-buffered per-sample block bytes: bf16 activation in, f32 fdm in,
    # f32 fdm out, f32 bcg out.
    per_sample = 2 * (cin * ptot * 2 + cf * p_out * 4 + cf * p_out * 4 + p_out * 4)
    budget = int(0.6 * vmem_limit)
    nb = max(1, budget // max(1, per_sample))
    nb = min(nb, 8, n)
    if n >= 2:
        # keep >= 2 grid steps so both v7x TensorCores get work
        nb = min(nb, max(1, (n + 1) // 2))
    return max(1, nb)


# --------------------------------------------------------------------------
# Wrapper: PyTorch-style NCHW in / NCHW out.
# --------------------------------------------------------------------------
def fdm_refine_block_forward(fdm, xs, params, *, batch_block=None):
    """fdm: (N, Cf, H, W); xs: list of 3 arrays (N, feat, h_i, w_i)."""
    N, Cf, H, W = fdm.shape
    feat = params["w_fuse"].shape[-1]
    Cin = 3 * feat
    Hp, Wp = H + 2, W + 2
    P = Hp * Wp                              # padded-frame flat length
    P_out = _round_up(P, 128)                # lane-aligned compute/store width
    OFF = W + 3                              # slack so all tap slices are in-bounds
    Ptot = _round_up(OFF + P_out + W + 3, 128)
    HW = H * W

    # ---- Bilinear resize (align_corners=False) + concat: plain-JAX glue ----
    resized = [
        jax.image.resize(x, (x.shape[0], x.shape[1], H, W),
                         method="bilinear", antialias=False)
        for x in xs
    ]
    xcat = jnp.concatenate(resized, axis=1).astype(jnp.bfloat16)   # (N, Cin, H, W)

    # Zero-pad the conv halo, flatten spatial onto lanes, add tap-slice margin.
    xpad = jnp.pad(xcat, ((0, 0), (0, 0), (1, 1), (1, 1))).reshape(N, Cin, P)
    xbuf = jnp.pad(xpad, ((0, 0), (0, 0), (OFF, Ptot - OFF - P)))   # (N, Cin, Ptot) bf16

    # fdm in the same padded-frame flat layout (zeros at invalid positions).
    fdm_pad = jnp.pad(fdm, ((0, 0), (0, 0), (1, 1), (1, 1))).reshape(N, Cf, P)
    fdm_pad = jnp.pad(fdm_pad, ((0, 0), (0, 0), (0, P_out - P))).astype(jnp.float32)

    # Validity mask over the padded frame (1 at real pixels, 0 at halo/margin).
    vmask2d = jnp.zeros((Hp, Wp), jnp.float32).at[1:-1, 1:-1].set(1.0)
    vmask = jnp.pad(vmask2d.reshape(1, P), ((0, 0), (0, P_out - P)))

    # Per-tap weights (Cout, Cin), tap order kh-major then kw (matches `taps`).
    wf9 = jnp.transpose(params["w_fuse"], (0, 1, 3, 2)).reshape(9, feat, Cin)
    wf9 = wf9.astype(jnp.bfloat16)
    bf = params["b_fuse"].reshape(feat, 1).astype(jnp.float32)
    gamma = params["gamma"].reshape(feat, 1).astype(jnp.float32)
    beta = params["beta"].reshape(feat, 1).astype(jnp.float32)
    wb = params["w_bcg"].reshape(feat, 1).astype(jnp.float32)
    bb = params["b_bcg"].reshape(1,).astype(jnp.float32)

    # Flat shift of tap (kh, kw) in the padded-frame layout.
    taps = tuple((kh - 1) * Wp + (kw - 1) for kh in range(3) for kw in range(3))

    vmem_limit = _vmem_limit_bytes()
    if batch_block is None:
        NB = _pick_batch_block(N, Cin, Ptot, Cf, P_out, vmem_limit)
    else:
        NB = max(1, min(int(batch_block), N))
    NG = pl.cdiv(N, NB)
    Npad = NG * NB

    if Npad != N:
        padb = ((0, Npad - N), (0, 0), (0, 0))
        xbuf = jnp.pad(xbuf, padb)
        fdm_pad = jnp.pad(fdm_pad, padb)

    kernel = functools.partial(
        _fdm_refine_kernel, nb=NB, n_valid=N, taps=taps, off=OFF,
        p_out=P_out, hw=HW, cout=feat)

    cost = pl.CostEstimate(
        flops=int(2 * Npad * 9 * feat * Cin * P_out),
        transcendentals=int(Npad * P_out),
        bytes_accessed=int(xbuf.size * 2 + fdm_pad.size * 4
                           + Npad * Cf * P_out * 4 + Npad * P_out * 4),
    )

    fdm_out_flat, bcg_flat = pl.pallas_call(
        kernel,
        out_shape=(
            jax.ShapeDtypeStruct((Npad, Cf, P_out), jnp.float32),
            jax.ShapeDtypeStruct((Npad, 1, P_out), jnp.float32),
        ),
        grid=(NG,),
        in_specs=[
            pl.BlockSpec((NB, Cin, Ptot), lambda n: (n, 0, 0)),
            pl.BlockSpec((NB, Cf, P_out), lambda n: (n, 0, 0)),
            pl.BlockSpec((1, P_out), lambda n: (0, 0)),
            pl.BlockSpec((9, feat, Cin), lambda n: (0, 0, 0)),
            pl.BlockSpec((feat, 1), lambda n: (0, 0)),
            pl.BlockSpec((feat, 1), lambda n: (0, 0)),
            pl.BlockSpec((feat, 1), lambda n: (0, 0)),
            pl.BlockSpec((feat, 1), lambda n: (0, 0)),
            pl.BlockSpec(memory_space=pltpu.MemorySpace.SMEM),
        ],
        out_specs=(
            pl.BlockSpec((NB, Cf, P_out), lambda n: (n, 0, 0)),
            pl.BlockSpec((NB, 1, P_out), lambda n: (n, 0, 0)),
        ),
        compiler_params=pltpu.CompilerParams(
            dimension_semantics=("parallel",),
            vmem_limit_bytes=vmem_limit,
        ),
        cost_estimate=cost,
    )(xbuf, fdm_pad, vmask, wf9, bf, gamma, beta, wb, bb)

    fdm_out = fdm_out_flat[:N, :, :P].reshape(N, Cf, Hp, Wp)[:, :, 1:-1, 1:-1]
    bcg_map = bcg_flat[:N, :, :P].reshape(N, 1, Hp, Wp)[:, :, 1:-1, 1:-1]
    return fdm_out, bcg_map


# --------------------------------------------------------------------------
# Pure-JAX reference (same math, XLA conv) for a sanity check.  The conv
# operands are rounded to bf16 to match the kernel's MXU precision choice;
# everything else is f32.
# --------------------------------------------------------------------------
def _reference_forward(fdm, xs, params):
    N, Cf, H, W = fdm.shape
    feat = params["w_fuse"].shape[-1]
    resized = [
        jax.image.resize(x, (x.shape[0], x.shape[1], H, W),
                         method="bilinear", antialias=False)
        for x in xs
    ]
    xcat = jnp.concatenate(resized, axis=1)
    xcat = xcat.astype(jnp.bfloat16).astype(jnp.float32)
    w = params["w_fuse"].astype(jnp.bfloat16).astype(jnp.float32)
    w_oihw = jnp.transpose(w, (3, 2, 0, 1))                       # HWIO -> OIHW
    y = lax.conv_general_dilated(
        xcat, w_oihw, window_strides=(1, 1), padding=((1, 1), (1, 1)),
        dimension_numbers=("NCHW", "OIHW", "NCHW"))
    y = y + params["b_fuse"].reshape(1, feat, 1, 1)
    mean = jnp.mean(y, axis=(1, 2, 3), keepdims=True)
    var = jnp.mean(jnp.square(y - mean), axis=(1, 2, 3), keepdims=True)
    y = (y - mean) * lax.rsqrt(var + 1e-5)
    y = y * params["gamma"].reshape(1, feat, 1, 1) + params["beta"].reshape(1, feat, 1, 1)
    y = jnp.maximum(y, 0.0)
    bcg = jnp.einsum("nchw,c->nhw", y, params["w_bcg"].reshape(feat))[:, None]
    bcg = bcg + params["b_bcg"].reshape(1, 1, 1, 1)
    bmap = jax.nn.sigmoid(bcg)
    mean_b = jnp.mean(bmap, axis=(2, 3), keepdims=True)
    fdm_out = fdm * (bmap > mean_b).astype(jnp.float32)
    return fdm_out, bcg, bmap, mean_b


def _check(fdm_out, bcg_map, fdm, xs, params):
    fdm_ref, bcg_ref, bmap_ref, mean_ref = _reference_forward(fdm, xs, params)
    assert jnp.allclose(bcg_map, bcg_ref, rtol=2e-3, atol=2e-3)
    # fdm (mask) path: compare away from the threshold boundary where a tiny
    # numerical difference could legitimately flip the strict '>' comparison.
    stable = jnp.abs(bmap_ref - mean_ref) > 1e-5
    assert jnp.allclose(jnp.where(stable, fdm_out, 0.0),
                        jnp.where(stable, fdm_ref, 0.0), rtol=2e-3, atol=2e-3)


if __name__ == "__main__":
    feat = 4
    N, Cf, H, W = 2, 1, 16, 16

    key = jax.random.PRNGKey(0)
    ks = jax.random.split(key, 16)

    params = {
        "w_fuse": 0.1 * jax.random.normal(ks[0], (3, 3, 3 * feat, feat), jnp.float32),
        "b_fuse": 0.1 * jax.random.normal(ks[1], (feat,), jnp.float32),
        "gamma": 1.0 + 0.1 * jax.random.normal(ks[2], (feat,), jnp.float32),
        "beta": 0.1 * jax.random.normal(ks[3], (feat,), jnp.float32),
        "w_bcg": 0.1 * jax.random.normal(ks[4], (feat, 1), jnp.float32),
        "b_bcg": 0.1 * jax.random.normal(ks[5], (1,), jnp.float32),
    }

    fdm = jax.random.normal(ks[6], (N, Cf, H, W), jnp.float32)
    xs = [
        jax.random.normal(ks[7], (N, feat, 8, 8), jnp.float32),
        jax.random.normal(ks[8], (N, feat, 4, 4), jnp.float32),
        jax.random.normal(ks[9], (N, feat, 16, 16), jnp.float32),
    ]

    # Auto batch block (NB=1, NG=2 -> feeds both v7x TCs).
    fdm_out, bcg_map = fdm_refine_block_forward(fdm, xs, params)
    jax.block_until_ready((fdm_out, bcg_map))
    assert fdm_out.shape == fdm.shape and bcg_map.shape == (N, 1, H, W)
    _check(fdm_out, bcg_map, fdm, xs, params)

    # Exercise the multi-sample-per-step path (NB=2, in-kernel fori_loop).
    fdm_out2, bcg_map2 = fdm_refine_block_forward(fdm, xs, params, batch_block=2)
    jax.block_until_ready((fdm_out2, bcg_map2))
    _check(fdm_out2, bcg_map2, fdm, xs, params)

    # Exercise the padded-batch path (N=3 -> NB=2, Npad=4, pl.when gating).
    N3 = 3
    fdm3 = jax.random.normal(ks[10], (N3, Cf, H, W), jnp.float32)
    xs3 = [
        jax.random.normal(ks[11], (N3, feat, 8, 8), jnp.float32),
        jax.random.normal(ks[12], (N3, feat, 4, 4), jnp.float32),
        jax.random.normal(ks[13], (N3, feat, 16, 16), jnp.float32),
    ]
    fdm_out3, bcg_map3 = fdm_refine_block_forward(fdm3, xs3, params)
    jax.block_until_ready((fdm_out3, bcg_map3))
    assert fdm_out3.shape == fdm3.shape and bcg_map3.shape == (N3, 1, H, W)
    _check(fdm_out3, bcg_map3, fdm3, xs3, params)

    print("KERNEL_OK")
</pallas_src>

<mosaic_0001>
module attributes {stable_mosaic.version = 11 : i64} {
  func.func @_fdm_refine_kernel(%arg0: i32, %arg1: memref<1x12x512xbf16, #tpu.memory_space<vmem>>, %arg2: memref<1x1x384xf32, #tpu.memory_space<vmem>>, %arg3: memref<1x384xf32, #tpu.memory_space<vmem>>, %arg4: memref<9x4x12xbf16, #tpu.memory_space<vmem>>, %arg5: memref<4x1xf32, #tpu.memory_space<vmem>>, %arg6: memref<4x1xf32, #tpu.memory_space<vmem>>, %arg7: memref<4x1xf32, #tpu.memory_space<vmem>>, %arg8: memref<4x1xf32, #tpu.memory_space<vmem>>, %arg9: memref<1xf32, #tpu.memory_space<smem>>, %arg10: memref<1x1x384xf32, #tpu.memory_space<vmem>>, %arg11: memref<1x1x384xf32, #tpu.memory_space<vmem>>) attributes {dimension_semantics = [#tpu.dimension_semantics<parallel>], iteration_bounds = array<i64: 2>, scalar_prefetch = 0 : i64, scratch_operands = 0 : i64, tpu.core_type = #tpu.core_type<tc>, window_params = [{transform_indices = @transform_0, window_bounds = array<i64: 1, 12, 512>}, {transform_indices = @transform_1, window_bounds = array<i64: 1, 1, 384>}, {pipeline_mode = #tpu.pipeline_mode<synchronous>, transform_indices = @transform_2, window_bounds = array<i64: 1, 384>}, {pipeline_mode = #tpu.pipeline_mode<synchronous>, transform_indices = @transform_3, window_bounds = array<i64: 9, 4, 12>}, {pipeline_mode = #tpu.pipeline_mode<synchronous>, transform_indices = @transform_4, window_bounds = array<i64: 4, 1>}, {pipeline_mode = #tpu.pipeline_mode<synchronous>, transform_indices = @transform_5, window_bounds = array<i64: 4, 1>}, {pipeline_mode = #tpu.pipeline_mode<synchronous>, transform_indices = @transform_6, window_bounds = array<i64: 4, 1>}, {pipeline_mode = #tpu.pipeline_mode<synchronous>, transform_indices = @transform_7, window_bounds = array<i64: 4, 1>}, {transform_indices = @transform_8, window_bounds = array<i64: 1>}, {transform_indices = @transform_9, window_bounds = array<i64: 1, 1, 384>}, {transform_indices = @transform_10, window_bounds = array<i64: 1, 1, 384>}]} {
    %c0 = arith.constant 0 : index
    %c0_0 = arith.constant 0 : index
    %0 = vector.load %arg3[%c0, %c0_0] : memref<1x384xf32, #tpu.memory_space<vmem>>, vector<1x384xf32>
    %c0_1 = arith.constant 0 : index
    %c0_2 = arith.constant 0 : index
    %1 = vector.load %arg5[%c0_1, %c0_2] : memref<4x1xf32, #tpu.memory_space<vmem>>, vector<4x1xf32>
    %c0_3 = arith.constant 0 : index
    %c0_4 = arith.constant 0 : index
    %2 = vector.load %arg6[%c0_3, %c0_4] : memref<4x1xf32, #tpu.memory_space<vmem>>, vector<4x1xf32>
    %c0_5 = arith.constant 0 : index
    %c0_6 = arith.constant 0 : index
    %3 = vector.load %arg7[%c0_5, %c0_6] : memref<4x1xf32, #tpu.memory_space<vmem>>, vector<4x1xf32>
    %c0_7 = arith.constant 0 : index
    %c0_8 = arith.constant 0 : index
    %4 = vector.load %arg8[%c0_7, %c0_8] : memref<4x1xf32, #tpu.memory_space<vmem>>, vector<4x1xf32>
    %c0_9 = arith.constant 0 : index
    %5 = memref.load %arg9[%c0_9] : memref<1xf32, #tpu.memory_space<smem>>
    %c0_10 = arith.constant 0 : index
    %c0_11 = arith.constant 0 : index
    %c0_12 = arith.constant 0 : index
    %6 = vector.load %arg4[%c0_10, %c0_11, %c0_12] : memref<9x4x12xbf16, #tpu.memory_space<vmem>>, vector<1x4x12xbf16>
    %7 = vector.shape_cast %6 : vector<1x4x12xbf16> to vector<4x12xbf16>
    %c1 = arith.constant 1 : index
    %c0_13 = arith.constant 0 : index
    %c0_14 = arith.constant 0 : index
    %8 = vector.load %arg4[%c1, %c0_13, %c0_14] : memref<9x4x12xbf16, #tpu.memory_space<vmem>>, vector<1x4x12xbf16>
    %9 = vector.shape_cast %8 : vector<1x4x12xbf16> to vector<4x12xbf16>
    %c2 = arith.constant 2 : index
    %c0_15 = arith.constant 0 : index
    %c0_16 = arith.constant 0 : index
    %10 = vector.load %arg4[%c2, %c0_15, %c0_16] : memref<9x4x12xbf16, #tpu.memory_space<vmem>>, vector<1x4x12xbf16>
    %11 = vector.shape_cast %10 : vector<1x4x12xbf16> to vector<4x12xbf16>
    %c3 = arith.constant 3 : index
    %c0_17 = arith.constant 0 : index
    %c0_18 = arith.constant 0 : index
    %12 = vector.load %arg4[%c3, %c0_17, %c0_18] : memref<9x4x12xbf16, #tpu.memory_space<vmem>>, vector<1x4x12xbf16>
    %13 = vector.shape_cast %12 : vector<1x4x12xbf16> to vector<4x12xbf16>
    %c4 = arith.constant 4 : index
    %c0_19 = arith.constant 0 : index
    %c0_20 = arith.constant 0 : index
    %14 = vector.load %arg4[%c4, %c0_19, %c0_20] : memref<9x4x12xbf16, #tpu.memory_space<vmem>>, vector<1x4x12xbf16>
    %15 = vector.shape_cast %14 : vector<1x4x12xbf16> to vector<4x12xbf16>
    %c5 = arith.constant 5 : index
    %c0_21 = arith.constant 0 : index
    %c0_22 = arith.constant 0 : index
    %16 = vector.load %arg4[%c5, %c0_21, %c0_22] : memref<9x4x12xbf16, #tpu.memory_space<vmem>>, vector<1x4x12xbf16>
    %17 = vector.shape_cast %16 : vector<1x4x12xbf16> to vector<4x12xbf16>
    %c6 = arith.constant 6 : index
    %c0_23 = arith.constant 0 : index
    %c0_24 = arith.constant 0 : index
    %18 = vector.load %arg4[%c6, %c0_23, %c0_24] : memref<9x4x12xbf16, #tpu.memory_space<vmem>>, vector<1x4x12xbf16>
    %19 = vector.shape_cast %18 : vector<1x4x12xbf16> to vector<4x12xbf16>
    %c7 = arith.constant 7 : index
    %c0_25 = arith.constant 0 : index
    %c0_26 = arith.constant 0 : index
    %20 = vector.load %arg4[%c7, %c0_25, %c0_26] : memref<9x4x12xbf16, #tpu.memory_space<vmem>>, vector<1x4x12xbf16>
    %21 = vector.shape_cast %20 : vector<1x4x12xbf16> to vector<4x12xbf16>
    %c8 = arith.constant 8 : index
    %c0_27 = arith.constant 0 : index
    %c0_28 = arith.constant 0 : index
    %22 = vector.load %arg4[%c8, %c0_27, %c0_28] : memref<9x4x12xbf16, #tpu.memory_space<vmem>>, vector<1x4x12xbf16>
    %23 = vector.shape_cast %22 : vector<1x4x12xbf16> to vector<4x12xbf16>
    %c1_i32 = arith.constant 1 : i32
    %24 = arith.muli %arg0, %c1_i32 : i32
    %c0_i32 = arith.constant 0 : i32
    %25 = arith.addi %24, %c0_i32 : i32
    %c2_i32 = arith.constant 2 : i32
    %26 = arith.cmpi slt, %25, %c2_i32 : i32
    %27 = arith.extui %26 : i1 to i32
    %c0_i32_29 = arith.constant 0 : i32
    %28 = arith.cmpi ne, %27, %c0_i32_29 : i32
    scf.if %28 {
      %cst = arith.constant 0.000000e+00 : f32
      %29 = vector.broadcast %cst : f32 to vector<4x384xf32>
      %30 = arith.index_cast %c0_i32 : i32 to index
      %c0_31 = arith.constant 0 : index
      %c0_32 = arith.constant 0 : index
      %31 = vector.load %arg1[%30, %c0_31, %c0_32] : memref<1x12x512xbf16, #tpu.memory_space<vmem>>, vector<1x12x384xbf16>
      %32 = vector.shape_cast %31 : vector<1x12x384xbf16> to vector<12x384xbf16>
      %cst_33 = arith.constant dense<0.000000e+00> : vector<4x384xf32>
      %33 = tpu.matmul %7, %32, %cst_33 {dimension_numbers = #tpu.dot_dimension_numbers<[1], [0], [0], [1], [0, 0, 1, 1], [], []>} : vector<4x12xbf16>, vector<12x384xbf16>, vector<4x384xf32> -> vector<4x384xf32>
      %34 = arith.addf %29, %33 : vector<4x384xf32>
      %35 = arith.index_cast %c0_i32 : i32 to index
      %c0_34 = arith.constant 0 : index
      %c1_35 = arith.constant 1 : index
      %36 = vector.load %arg1[%35, %c0_34, %c1_35] : memref<1x12x512xbf16, #tpu.memory_space<vmem>>, vector<1x12x384xbf16>
      %37 = vector.shape_cast %36 : vector<1x12x384xbf16> to vector<12x384xbf16>
      %cst_36 = arith.constant dense<0.000000e+00> : vector<4x384xf32>
      %38 = tpu.matmul %9, %37, %cst_36 {dimension_numbers = #tpu.dot_dimension_numbers<[1], [0], [0], [1], [0, 0, 1, 1], [], []>} : vector<4x12xbf16>, vector<12x384xbf16>, vector<4x384xf32> -> vector<4x384xf32>
      %39 = arith.addf %34, %38 : vector<4x384xf32>
      %40 = arith.index_cast %c0_i32 : i32 to index
      %c0_37 = arith.constant 0 : index
      %c2_38 = arith.constant 2 : index
      %41 = vector.load %arg1[%40, %c0_37, %c2_38] : memref<1x12x512xbf16, #tpu.memory_space<vmem>>, vector<1x12x384xbf16>
      %42 = vector.shape_cast %41 : vector<1x12x384xbf16> to vector<12x384xbf16>
      %cst_39 = arith.constant dense<0.000000e+00> : vector<4x384xf32>
      %43 = tpu.matmul %11, %42, %cst_39 {dimension_numbers = #tpu.dot_dimension_numbers<[1], [0], [0], [1], [0, 0, 1, 1], [], []>} : vector<4x12xbf16>, vector<12x384xbf16>, vector<4x384xf32> -> vector<4x384xf32>
      %44 = arith.addf %39, %43 : vector<4x384xf32>
      %45 = arith.index_cast %c0_i32 : i32 to index
      %c0_40 = arith.constant 0 : index
      %c18 = arith.constant 18 : index
      %46 = vector.load %arg1[%45, %c0_40, %c18] : memref<1x12x512xbf16, #tpu.memory_space<vmem>>, vector<1x12x384xbf16>
      %47 = vector.shape_cast %46 : vector<1x12x384xbf16> to vector<12x384xbf16>
      %cst_41 = arith.constant dense<0.000000e+00> : vector<4x384xf32>
      %48 = tpu.matmul %13, %47, %cst_41 {dimension_numbers = #tpu.dot_dimension_numbers<[1], [0], [0], [1], [0, 0, 1, 1], [], []>} : vector<4x12xbf16>, vector<12x384xbf16>, vector<4x384xf32> -> vector<4x384xf32>
      %49 = arith.addf %44, %48 : vector<4x384xf32>
      %50 = arith.index_cast %c0_i32 : i32 to index
      %c0_42 = arith.constant 0 : index
      %c19 = arith.constant 19 : index
      %51 = vector.load %arg1[%50, %c0_42, %c19] : memref<1x12x512xbf16, #tpu.memory_space<vmem>>, vector<1x12x384xbf16>
      %52 = vector.shape_cast %51 : vector<1x12x384xbf16> to vector<12x384xbf16>
      %cst_43 = arith.constant dense<0.000000e+00> : vector<4x384xf32>
      %53 = tpu.matmul %15, %52, %cst_43 {dimension_numbers = #tpu.dot_dimension_numbers<[1], [0], [0], [1], [0, 0, 1, 1], [], []>} : vector<4x12xbf16>, vector<12x384xbf16>, vector<4x384xf32> -> vector<4x384xf32>
      %54 = arith.addf %49, %53 : vector<4x384xf32>
      %55 = arith.index_cast %c0_i32 : i32 to index
      %c0_44 = arith.constant 0 : index
      %c20 = arith.constant 20 : index
      %56 = vector.load %arg1[%55, %c0_44, %c20] : memref<1x12x512xbf16, #tpu.memory_space<vmem>>, vector<1x12x384xbf16>
      %57 = vector.shape_cast %56 : vector<1x12x384xbf16> to vector<12x384xbf16>
      %cst_45 = arith.constant dense<0.000000e+00> : vector<4x384xf32>
      %58 = tpu.matmul %17, %57, %cst_45 {dimension_numbers = #tpu.dot_dimension_numbers<[1], [0], [0], [1], [0, 0, 1, 1], [], []>} : vector<4x12xbf16>, vector<12x384xbf16>, vector<4x384xf32> -> vector<4x384xf32>
      %59 = arith.addf %54, %58 : vector<4x384xf32>
      %60 = arith.index_cast %c0_i32 : i32 to index
      %c0_46 = arith.constant 0 : index
      %c36 = arith.constant 36 : index
      %61 = vector.load %arg1[%60, %c0_46, %c36] : memref<1x12x512xbf16, #tpu.memory_space<vmem>>, vector<1x12x384xbf16>
      %62 = vector.shape_cast %61 : vector<1x12x384xbf16> to vector<12x384xbf16>
      %cst_47 = arith.constant dense<0.000000e+00> : vector<4x384xf32>
      %63 = tpu.matmul %19, %62, %cst_47 {dimension_numbers = #tpu.dot_dimension_numbers<[1], [0], [0], [1], [0, 0, 1, 1], [], []>} : vector<4x12xbf16>, vector<12x384xbf16>, vector<4x384xf32> -> vector<4x384xf32>
      %64 = arith.addf %59, %63 : vector<4x384xf32>
      %65 = arith.index_cast %c0_i32 : i32 to index
      %c0_48 = arith.constant 0 : index
      %c37 = arith.constant 37 : index
      %66 = vector.load %arg1[%65, %c0_48, %c37] : memref<1x12x512xbf16, #tpu.memory_space<vmem>>, vector<1x12x384xbf16>
      %67 = vector.shape_cast %66 : vector<1x12x384xbf16> to vector<12x384xbf16>
      %cst_49 = arith.constant dense<0.000000e+00> : vector<4x384xf32>
      %68 = tpu.matmul %21, %67, %cst_49 {dimension_numbers = #tpu.dot_dimension_numbers<[1], [0], [0], [1], [0, 0, 1, 1], [], []>} : vector<4x12xbf16>, vector<12x384xbf16>, vector<4x384xf32> -> vector<4x384xf32>
      %69 = arith.addf %64, %68 : vector<4x384xf32>
      %70 = arith.index_cast %c0_i32 : i32 to index
      %c0_50 = arith.constant 0 : index
      %c38 = arith.constant 38 : index
      %71 = vector.load %arg1[%70, %c0_50, %c38] : memref<1x12x512xbf16, #tpu.memory_space<vmem>>, vector<1x12x384xbf16>
      %72 = vector.shape_cast %71 : vector<1x12x384xbf16> to vector<12x384xbf16>
      %cst_51 = arith.constant dense<0.000000e+00> : vector<4x384xf32>
      %73 = tpu.matmul %23, %72, %cst_51 {dimension_numbers = #tpu.dot_dimension_numbers<[1], [0], [0], [1], [0, 0, 1, 1], [], []>} : vector<4x12xbf16>, vector<12x384xbf16>, vector<4x384xf32> -> vector<4x384xf32>
      %74 = arith.addf %69, %73 : vector<4x384xf32>
      %75 = vector.broadcast %1 : vector<4x1xf32> to vector<4x384xf32>
      %76 = arith.addf %74, %75 : vector<4x384xf32>
      %77 = vector.broadcast %0 : vector<1x384xf32> to vector<4x384xf32>
      %78 = arith.mulf %76, %77 : vector<4x384xf32>
      %79 = vector.shape_cast %78 : vector<4x384xf32> to vector<1x4x384xf32>
      %cst_52 = arith.constant dense<0.000000e+00> : vector<1xf32>
      %80 = vector.multi_reduction <add>, %79, %cst_52 [1, 2] : vector<1x4x384xf32> to vector<1xf32>
      %81 = vector.shape_cast %80 : vector<1xf32> to vector<1x1x1xf32>
      %82 = vector.extract %81[0, 0, 0] : f32 from vector<1x1x1xf32>
      %cst_53 = arith.constant 9.765625E-4 : f32
      %83 = arith.mulf %82, %cst_53 : f32
      %84 = vector.broadcast %83 : f32 to vector<4x384xf32>
      %85 = arith.subf %76, %84 : vector<4x384xf32>
      %86 = arith.mulf %85, %85 : vector<4x384xf32>
      %87 = vector.broadcast %0 : vector<1x384xf32> to vector<4x384xf32>
      %88 = arith.mulf %86, %87 : vector<4x384xf32>
      %89 = vector.shape_cast %88 : vector<4x384xf32> to vector<1x4x384xf32>
      %cst_54 = arith.constant dense<0.000000e+00> : vector<1xf32>
      %90 = vector.multi_reduction <add>, %89, %cst_54 [1, 2] : vector<1x4x384xf32> to vector<1xf32>
      %91 = vector.shape_cast %90 : vector<1xf32> to vector<1x1x1xf32>
      %92 = vector.extract %91[0, 0, 0] : f32 from vector<1x1x1xf32>
      %cst_55 = arith.constant 9.765625E-4 : f32
      %93 = arith.mulf %92, %cst_55 : f32
      %cst_56 = arith.constant 9.99999974E-6 : f32
      %94 = arith.addf %93, %cst_56 : f32
      %95 = math.rsqrt %94 : f32
      %96 = vector.broadcast %95 : f32 to vector<4x384xf32>
      %97 = arith.mulf %85, %96 : vector<4x384xf32>
      %98 = vector.broadcast %2 : vector<4x1xf32> to vector<4x384xf32>
      %99 = arith.mulf %97, %98 : vector<4x384xf32>
      %100 = vector.broadcast %3 : vector<4x1xf32> to vector<4x384xf32>
      %101 = arith.addf %99, %100 : vector<4x384xf32>
      %cst_57 = arith.constant 0.000000e+00 : f32
      %102 = vector.broadcast %cst_57 : f32 to vector<4x384xf32>
      %103 = arith.maximumf %101, %102 : vector<4x384xf32>
      %104 = vector.broadcast %4 : vector<4x1xf32> to vector<4x384xf32>
      %105 = arith.mulf %103, %104 : vector<4x384xf32>
      %cst_58 = arith.constant dense<0.000000e+00> : vector<384xf32>
      %106 = vector.multi_reduction <add>, %105, %cst_58 [0] : vector<4x384xf32> to vector<384xf32>
      %107 = vector.shape_cast %106 : vector<384xf32> to vector<1x384xf32>
      %108 = vector.broadcast %5 : f32 to vector<1x384xf32>
      %109 = arith.addf %107, %108 : vector<1x384xf32>
      %110 = arith.index_cast %c0_i32 : i32 to index
      %c0_59 = arith.constant 0 : index
      %c0_60 = arith.constant 0 : index
      %111 = vector.load %arg11[%110, %c0_59, %c0_60] : memref<1x1x384xf32, #tpu.memory_space<vmem>>, vector<1x1x384xf32>
      %112 = vector.shape_cast %111 : vector<1x1x384xf32> to vector<1x384xf32>
      %113 = vector.shape_cast %109 : vector<1x384xf32> to vector<1x1x384xf32>
      tpu.vector_store %arg11[%110, %c0_59, %c0_60], %113 {strides = array<i32>} : memref<1x1x384xf32, #tpu.memory_space<vmem>>, vector<1x1x384xf32>,
      %114 = arith.negf %109 : vector<1x384xf32>
      %115 = math.exp %114 : vector<1x384xf32>
      %cst_61 = arith.constant 1.000000e+00 : f32
      %116 = vector.broadcast %cst_61 : f32 to vector<1x384xf32>
      %117 = arith.addf %116, %115 : vector<1x384xf32>
      %118 = arith.divf %116, %117 : vector<1x384xf32>
      %119 = arith.mulf %118, %0 : vector<1x384xf32>
      %120 = vector.shape_cast %119 : vector<1x384xf32> to vector<1x1x384xf32>
      %cst_62 = arith.constant dense<0.000000e+00> : vector<1xf32>
      %121 = vector.multi_reduction <add>, %120, %cst_62 [1, 2] : vector<1x1x384xf32> to vector<1xf32>
      %122 = vector.shape_cast %121 : vector<1xf32> to vector<1x1x1xf32>
      %123 = vector.extract %122[0, 0, 0] : f32 from vector<1x1x1xf32>
      %cst_63 = arith.constant 3.906250e-03 : f32
      %124 = arith.mulf %123, %cst_63 : f32
      %125 = vector.broadcast %124 : f32 to vector<1x384xf32>
      %126 = arith.cmpf ogt, %118, %125 : vector<1x384xf32>
      %127 = arith.index_cast %c0_i32 : i32 to index
      %c0_64 = arith.constant 0 : index
      %c0_65 = arith.constant 0 : index
      %128 = vector.load %arg2[%127, %c0_64, %c0_65] : memref<1x1x384xf32, #tpu.memory_space<vmem>>, vector<1x1x384xf32>
      %129 = vector.shape_cast %128 : vector<1x1x384xf32> to vector<1x384xf32>
      %cst_66 = arith.constant 0.000000e+00 : f32
      %130 = vector.broadcast %cst_66 : f32 to vector<1x384xf32>
      %131 = arith.select %126, %129, %130 : vector<1x384xi1>, vector<1x384xf32>
      %132 = arith.index_cast %c0_i32 : i32 to index
      %c0_67 = arith.constant 0 : index
      %c0_68 = arith.constant 0 : index
      %133 = vector.load %arg10[%132, %c0_67, %c0_68] : memref<1x1x384xf32, #tpu.memory_space<vmem>>, vector<1x1x384xf32>
      %134 = vector.shape_cast %133 : vector<1x1x384xf32> to vector<1x384xf32>
      %135 = vector.shape_cast %131 : vector<1x384xf32> to vector<1x1x384xf32>
      tpu.vector_store %arg10[%132, %c0_67, %c0_68], %135 {strides = array<i32>} : memref<1x1x384xf32, #tpu.memory_space<vmem>>, vector<1x1x384xf32>,
    } else {
    }
    %c1_i32_30 = arith.constant 1 : i32
    return
  }
  func.func @transform_0(%arg0: i32) -> (i32, i32, i32) {
    %c0_i32 = arith.constant 0 : i32
    %c0_i32_0 = arith.constant 0 : i32
    %c0_i32_1 = arith.constant 0 : i32
    return %arg0, %c0_i32, %c0_i32_0 : i32, i32, i32
  }
  func.func @transform_1(%arg0: i32) -> (i32, i32, i32) {
    %c0_i32 = arith.constant 0 : i32
    %c0_i32_0 = arith.constant 0 : i32
    %c0_i32_1 = arith.constant 0 : i32
    return %arg0, %c0_i32, %c0_i32_0 : i32, i32, i32
  }
  func.func @transform_2(%arg0: i32) -> (i32, i32) {
    %c0_i32 = arith.constant 0 : i32
    %c0_i32_0 = arith.constant 0 : i32
    %c0_i32_1 = arith.constant 0 : i32
    return %c0_i32, %c0_i32_0 : i32, i32
  }
  func.func @transform_3(%arg0: i32) -> (i32, i32, i32) {
    %c0_i32 = arith.constant 0 : i32
    %c0_i32_0 = arith.constant 0 : i32
    %c0_i32_1 = arith.constant 0 : i32
    %c0_i32_2 = arith.constant 0 : i32
    return %c0_i32, %c0_i32_0, %c0_i32_1 : i32, i32, i32
  }
  func.func @transform_4(%arg0: i32) -> (i32, i32) {
    %c0_i32 = arith.constant 0 : i32
    %c0_i32_0 = arith.constant 0 : i32
    %c0_i32_1 = arith.constant 0 : i32
    return %c0_i32, %c0_i32_0 : i32, i32
  }
  func.func @transform_5(%arg0: i32) -> (i32, i32) {
    %c0_i32 = arith.constant 0 : i32
    %c0_i32_0 = arith.constant 0 : i32
    %c0_i32_1 = arith.constant 0 : i32
    return %c0_i32, %c0_i32_0 : i32, i32
  }
  func.func @transform_6(%arg0: i32) -> (i32, i32) {
    %c0_i32 = arith.constant 0 : i32
    %c0_i32_0 = arith.constant 0 : i32
    %c0_i32_1 = arith.constant 0 : i32
    return %c0_i32, %c0_i32_0 : i32, i32
  }
  func.func @transform_7(%arg0: i32) -> (i32, i32) {
    %c0_i32 = arith.constant 0 : i32
    %c0_i32_0 = arith.constant 0 : i32
    %c0_i32_1 = arith.constant 0 : i32
    return %c0_i32, %c0_i32_0 : i32, i32
  }
  func.func @transform_8(%arg0: i32) -> i32 {
    %c0_i32 = arith.constant 0 : i32
    %c0_i32_0 = arith.constant 0 : i32
    return %c0_i32 : i32
  }
  func.func @transform_9(%arg0: i32) -> (i32, i32, i32) {
    %c0_i32 = arith.constant 0 : i32
    %c0_i32_0 = arith.constant 0 : i32
    %c0_i32_1 = arith.constant 0 : i32
    return %arg0, %c0_i32, %c0_i32_0 : i32, i32, i32
  }
  func.func @transform_10(%arg0: i32) -> (i32, i32, i32) {
    %c0_i32 = arith.constant 0 : i32
    %c0_i32_0 = arith.constant 0 : i32
    %c0_i32_1 = arith.constant 0 : i32
    return %arg0, %c0_i32, %c0_i32_0 : i32, i32, i32
  }
}

</mosaic_0001>

<bundles_post_ra>
// kernel: tpu_custom_call.1
= control target key start
LH: loop header
LB: loop body
LE: loop exit
PB: predicated region body
PF: predicated region fallthrough
CT: control target
= control target key end

     0   :  { %s2562_s0 = inlined_call_operand.vmem [shape: bf16[2,12,512], index: 0, kind: input, shape index: {}]   ;;  %s2563_s1 = inlined_call_operand.vmem [shape: f32[2,1,384], index: 1, kind: input, shape index: {}]   ;;  %s2564_s2 = inlined_call_operand.vmem [shape: f32[1,384], index: 2, kind: input, shape index: {}]   ;;  %s2565_s3 = inlined_call_operand.vmem [shape: bf16[9,4,12], index: 3, kind: input, shape index: {}]   ;;  %s2566_s4 = inlined_call_operand.vmem [shape: f32[4,1], index: 4, kind: input, shape index: {}]   ;;  %s2567_s5 = inlined_call_operand.vmem [shape: f32[4,1], index: 5, kind: input, shape index: {}]   ;;  %s2568_s6 = inlined_call_operand.vmem [shape: f32[4,1], index: 6, kind: input, shape index: {}]   ;;  %s2569_s7 = inlined_call_operand.vmem [shape: f32[4,1], index: 7, kind: input, shape index: {}]   ;;  %s2570_s8 = inlined_call_operand.<no memory space> [shape: f32[1], index: 8, kind: input, shape index: {}]   ;;  %s2571_s9 = inlined_call_operand.hbm [shape: f32[2,1,384], index: 9, kind: output, shape index: {0}]   ;;  %s2572_s10 = inlined_call_operand.hbm [shape: f32[2,1,384], index: 10, kind: output, shape index: {1}]  }
   0x1   :  { %2573 = sst [smem:[#allocation9_spill]] %s2562_s0 }
   0x2   :  { %2574 = sst [smem:[#allocation10_spill]] %s2564_s2 }
   0x3   :  { %2575 = sst [smem:[#allocation11_spill]] %s2566_s4 }
   0x4   :  { %2576 = sst [smem:[#allocation12_spill]] %s2567_s5 }
   0x5   :  { %16 = sst [smem:[#allocation2]] %s2570_s8 }
   0x6   :  { %17 = vsyncpa [#allocation4], 0 }
   0x7   :  { %19 = vsyncpa [#allocation4 + $0x1], 0 }
   0x8   :  { %20 = vsyncpa [#allocation6], 0 }
   0x9   :  { %22 = vsyncpa [#allocation6 + $0x1], 0  ;;  %s2166_s15 = smov 0   ;;  %s2168_s16 = smov 0  }
   0xa   :  { %s2170_s17 = smov 0   ;;  %s2172_s18 = smov 0  }
   0xb LB: > { %s2187_s8 = sadd.s32 4294967295, %s2092_s18   ;;  %s1784_s19 = sadd.s32 4294967294, %s2092_s18   ;;  %s2092_s18 = sphi %s2172_s18, %s2588_s18   ;;  %s2088_s17 = sphi %s2170_s17, %s2587_s17   ;;  %s2084_s16 = sphi %s2168_s16, %s2586_s16   ;;  %s2080_s15 = sphi %s2166_s15, %s2585_s15  }
   0xc   : > { %s2191_s20 = sadd.s32 1, %s2092_s18   ;;  %s234_s21 = sadd.s32 1, %s2088_s17 }
   0xd   : > { %s231_s22 = ssub.s32 %s2092_s18, %s2191_s20  ;;  %p244_p0 = scmp.ne.s32.totalorder %s2088_s17, %s2084_s16 }
   0xe   : > { %p232_p1 = scmp.eq.s32.totalorder %s231_s22, 0  ;;  %p245_p2 = scmp.eq.s32.totalorder %s2187_s8, 1 }
   0xf   : > { %p250_p3 = scmp.ne.s32.totalorder %s2084_s16, %s2080_s15  ;;  %p251_p4 = scmp.eq.s32.totalorder %s1784_s19, 1 }
  0x10   : > { %s2202_s23 = scalar_select %p232_p1, %s2088_s17, %s234_s21  }
  0x11   : > { %p2204_p5 = por %p245_p2, %p244_p0  ;;  %p2208_p6 = por %p251_p4, %p250_p3 }
  0x12   : > { %p1787_p7 = scmp.ge.s32.totalorder %s2092_s18, 1  ;;  %p331_p8 = scmp.lt.s32.totalorder %s2092_s18, 3 }
  0x14   : > { %p332_p9 = pnand %p1787_p7, %p331_p8 }
  0x15   : > { %s2215_s26 = sand.u32 (!%p332_p9), 1, %s2084_s16   ;;  %p378_p10 = scmp.lt.s32.totalorder (!%p332_p9), %s2187_s8, 1 }
  0x16   : > { %335 = sbr.rel (%p332_p9) target bundleno = 1242 (0x4da), region = 56  ;;  %s2579_s2 = sld [smem:[#allocation10_spill]] (!%p332_p9) }
  0x17   : > { %s2580_s4 = sld [smem:[#allocation11_spill]] (!%p332_p9)  ;;  %s1911_s11 = smul.u32 (!%p332_p9), 3, %s2215_s26 }
  0x18   : > { %s2581_s5 = sld [smem:[#allocation12_spill]] (!%p332_p9)  ;;  %p1798_p11 = scmp.ge.s32.totalorder (!%p332_p9), %s2187_s8, 2 }
  0x19   : > { %s2582_s0 = sld [smem:[#allocation9_spill]] (!%p332_p9)  ;;  %s2304_s14 = scalar_lea.vmem (!%p332_p9), [#allocation5], %s1911_s11 }
  0x1a   : > { %s2275_s13 = sld [smem:[#allocation2]] (!%p332_p9) }
  0x1b   : > { %v2237_v3 = vld [vmem:[%s2568_s6] sm:$0xf]  ;;  %s379_s21 = scalar_select %p378_p10, %s2187_s8, 1  ;;  %v2258_v7 = vld [vmem:[%s2565_s3 + $0x4] sm:$0x3] }
  0x1c   : > { %v2221_v0 = vld [vmem:[%s2579_s2] sm:$0x7]  ;;  %v2263_v8 = vld [vmem:[%s2565_s3 + $0x6] sm:$0x3]  ;;  %v2268_v9 = vld [vmem:[%s2565_s3 + $0x8] sm:$0x3] }
  0x1d   : > { %v2226_v1 = vld [vmem:[%s2580_s4] sm:$0xf]  ;;  %s1838_s19 = sshll.u32 %s379_s21, 5  ;;  %s1912_s2 = smul.u32 3, %s379_s21  ;;  %v2280_v10 = vld [vmem:[%s2565_s3 + $0xa] sm:$0x3] }
  0x1e   : > { %v2232_v2 = vld [vmem:[%s2581_s5] sm:$0xf]  ;;  %v2285_v11 = vld [vmem:[%s2565_s3 + $0xc] sm:$0x3]  ;;  %v2295_v12 = vld [vmem:[%s2565_s3 + $0xe] sm:$0x3] }
  0x1f   : > { %v2243_v4 = vld [vmem:[%s2569_s7] sm:$0xf]  ;;  %s2273_s4 = scalar_lea.vmem %s2582_s0, %s1838_s19  ;;  %s2290_s29 = scalar_lea.vmem %s2563_s1, %s1912_s2  ;;  %v2300_v13 = vld [vmem:[%s2565_s3 + $0x10] sm:$0x3] }
  0x20   : > { %v2248_v5 = vld [vmem:[%s2565_s3] sm:$0x3]  ;;  %v2253_v6 = vld [vmem:[%s2565_s3 + $0x2] sm:$0x3]  ;;  %s2302_s5 = scalar_lea.vmem [#allocation3], %s1911_s11  ;;  %414 = sbr.rel (%p1798_p11) target bundleno = 1195 (0x4ab), region = 60 }
  0x21   : > { %s2094_s2 = smov (!%p1798_p11), 127   ;;  %s2098_s0 = smov (!%p1798_p11), 126  }
  0x22   : > { %s2099_s11 = smov (!%p1798_p11), 110   ;;  %s2100_s21 = smov (!%p1798_p11), 109  }
  0x23   : > { %s2101_s22 = smov (!%p1798_p11), 108   ;;  %s2102_s27 = smov (!%p1798_p11), 92  }
  0x24   : > { %s2103_s28 = smov (!%p1798_p11), 91   ;;  %s2104_s30 = smov (!%p1798_p11), 90  }
  0x25   : > { %v1981_v14 = vld [vmem:[%s2273_s4 + $0x8] ss:$16 sps:$4 sm:$0x3f]   ;;  %v2309_v15 = vld [vmem:[%s2273_s4] ss:$16 sps:$4 sm:$0x3f]  }
  0x26   : > { %441 = vrot.lane.b32.xlu1 %v1981_v14, %s2094_s2  ;;  %v1985_v16 = vld [vmem:[%s2273_s4 + $0xc] ss:$16 sps:$4 sm:$0x3f]   ;;  %437 = vrot.lane.b32.xlu0 %v2309_v15, %s2094_s2  ;;  %v2314_v17 = vld [vmem:[%s2273_s4 + $0x4] ss:$16 sps:$4 sm:$0x3f]  }
  0x27   : > { %v2095_v18 = vmov 0.0   ;;  %v2096_v19 = vmov 0   ;;  %vm2097_vm0 = vmmov 0   ;;  %vm445_vm1 = vcmask 1039360  }
  0x28   : > { %1857 = vmatprep.subr.bf16.mxu1 %v2095_v18  ;;  %495 = vmatprep.mubr.bf16.mxu0 %v2096_v19  ;;  %vm453_vm2 = vcmask 1045504   ;;  %v1987_v23 = vld [vmem:[%s2273_s4 + $0x8] ss:$16 sps:$4 sm:$0x3f]   ;;  %vm449_vm3 = vcmask 97280   ;;  %vm650_vm4 = vcmask 1031168  }
  0x29   : > { %1859 = vmatprep.mubr.msk.bf16.mxu1 %vm2097_vm0, %v2095_v18  ;;  %1979 = vset.pattern.permute.xlu0 %v2096_v19  ;;  %v559_v31 = vsel %vm453_vm2, %v1987_v23, 0  ;;  %v553_v33 = vsel %vm453_vm2, %v2309_v15, 0  ;;  %vm758_vm5 = vcmask 900096   ;;  %vm866_vm6 = vcmask 891904  }
  0x2a   : > { %443 = vrot.lane.b32.xlu1 %v1985_v16, %s2094_s2  ;;  %439 = vrot.lane.b32.xlu0 %v2314_v17, %s2094_s2  ;;  %vm974_vm7 = vcmask 883712   ;;  %vm1082_vm8 = vcmask 752640   ;;  %vm1190_vm9 = vcmask 744448   ;;  %vm1298_vm10 = vcmask 736256  }
  0x2b   : > { %1980 = vset.pattern.permute.xlu1 %v2096_v19  ;;  %vm1425_vm11 = vcmask 1043456   ;;  %vm1579_vm13 = vcmask 1040384  }
  0x2e   : > { %644 = vrot.lane.b32.xlu1 %v2314_v17, %s2098_s0  ;;  %642 = vrot.lane.b32.xlu0 %v2309_v15, %s2098_s0 }
  0x32   : > { %648 = vrot.lane.b32.xlu1 %v1985_v16, %s2098_s0  ;;  %646 = vrot.lane.b32.xlu0 %v1981_v14, %s2098_s0 }
  0x36   : > { %752 = vrot.lane.b32.xlu1 %v2314_v17, %s2099_s11  ;;  %750 = vrot.lane.b32.xlu0 %v2309_v15, %s2099_s11 }
  0x3a   : > { %756 = vrot.lane.b32.xlu1 %v1985_v16, %s2099_s11  ;;  %754 = vrot.lane.b32.xlu0 %v1981_v14, %s2099_s11 }
  0x3e   : > { %860 = vrot.lane.b32.xlu1 %v2314_v17, %s2100_s21  ;;  %858 = vrot.lane.b32.xlu0 %v2309_v15, %s2100_s21 }
  0x42   : > { %864 = vrot.lane.b32.xlu1 %v1985_v16, %s2100_s21  ;;  %862 = vrot.lane.b32.xlu0 %v1981_v14, %s2100_s21 }
  0x46   : > { %968 = vrot.lane.b32.xlu1 %v2314_v17, %s2101_s22  ;;  %966 = vrot.lane.b32.xlu0 %v2309_v15, %s2101_s22 }
  0x4a   : > { %972 = vrot.lane.b32.xlu1 %v1985_v16, %s2101_s22  ;;  %970 = vrot.lane.b32.xlu0 %v1981_v14, %s2101_s22 }
  0x4e   : > { %1076 = vrot.lane.b32.xlu1 %v2314_v17, %s2102_s27  ;;  %1074 = vrot.lane.b32.xlu0 %v2309_v15, %s2102_s27 }
  0x52   : > { %1080 = vrot.lane.b32.xlu1 %v1985_v16, %s2102_s27  ;;  %1078 = vrot.lane.b32.xlu0 %v1981_v14, %s2102_s27 }
  0x56   : > { %1184 = vrot.lane.b32.xlu1 %v2314_v17, %s2103_s28  ;;  %1182 = vrot.lane.b32.xlu0 %v2309_v15, %s2103_s28 }
  0x5a   : > { %1188 = vrot.lane.b32.xlu1 %v1985_v16, %s2103_s28  ;;  %1186 = vrot.lane.b32.xlu0 %v1981_v14, %s2103_s28 }
  0x5e   : > { %1292 = vrot.lane.b32.xlu1 %v2314_v17, %s2104_s30  ;;  %1290 = vrot.lane.b32.xlu0 %v2309_v15, %s2104_s30 }
  0x62   : > { %1296 = vrot.lane.b32.xlu1 %v1985_v16, %s2104_s30  ;;  %1294 = vrot.lane.b32.xlu0 %v1981_v14, %s2104_s30 }
  0x66   : > { %1400 = vperm.xlu0 %1979, %v2226_v1  }
  0x98   : > { %v442_v20 = vpop.permute.xlu1 %441  ;;  %v438_v21 = vpop.permute.xlu0 %437 }
  0x9c   : > { %v444_v22 = vpop.permute.xlu1 %443  ;;  %v440_v25 = vpop.permute.xlu0 %439 }
  0x9d   : > { %v448_v24 = vsel %vm445_vm1, %v442_v20, %v444_v22  ;;  %v447_v27 = vsel %vm445_vm1, %v440_v25, %v442_v20  ;;  %v446_v28 = vsel %vm445_vm1, %v438_v21, %v440_v25 }
  0x9e   : > { %v461_v26 = vsel %vm453_vm2, %v448_v24, 0  ;;  %1803 = vmatprep.subr.msk.bf16.mxu0 %vm453_vm2, %v447_v27  ;;  %v455_v29 = vsel %vm453_vm2, %v446_v28, 0 }
  0x9f   : > { %1858 = vmatpush3.bf16.msra.mxu1 %v461_v26  ;;  %478 = vmatpush1.bf16.msra.mxu0 %v455_v29 }
  0xa0   : > { %v645_v30 = vpop.permute.xlu1 %644  ;;  %1863 = vmatprep.subr.bf16.mxu1 %v2095_v18  ;;  %1807 = vmatprep.subr.msk.bf16.mxu0 %vm453_vm2, %v2314_v17  ;;  %v643_v32 = vpop.permute.xlu0 %642 }
  0xa1   : > { %v651_v36 = vsel %vm650_vm4, %v643_v32, %v645_v30 }
  0xa2   : > { %1860 = vmatmul.mubr.msk.bf16.vlgmr.msra.gmra.mxu1 %vm449_vm3, %v2253_v6  ;;  %1804 = vmatmul.mubr.msk.bf16.vlgmr.msra.gmra.mxu0 %vm449_vm3, %v2253_v6  ;;  %v658_v41 = vsel %vm453_vm2, %v651_v36, 0 }
  0xa3   : > { %1864 = vmatpush3.bf16.msra.mxu1 %v559_v31  ;;  %1865 = vmatprep.mubr.msk.bf16.mxu1 %vm2097_vm0, %v2095_v18 }
  0xa4   : > { %v649_v34 = vpop.permute.xlu1 %648  ;;  %1869 = vmatprep.subr.bf16.mxu1 %v2095_v18  ;;  %576 = vmatpush1.bf16.msra.mxu0 %v553_v33  ;;  %v647_v35 = vpop.permute.xlu0 %646 }
  0xa5   : > { %593 = vmatprep.mubr.bf16.mxu0 %v2096_v19  ;;  %v652_v37 = vsel %vm650_vm4, %v645_v30, %v647_v35  ;;  %v653_v38 = vsel %vm650_vm4, %v647_v35, %v649_v34 }
  0xa6   : > { %v664_v39 = vsel %vm453_vm2, %v653_v38, 0  ;;  %1810 = vmatprep.subr.msk.bf16.mxu0 %vm453_vm2, %v652_v37 }
  0xa8   : > { %v753_v40 = vpop.permute.xlu1 %752  ;;  %v751_v42 = vpop.permute.xlu0 %750 }
  0xa9   : > { %v759_v45 = vsel %vm758_vm5, %v751_v42, %v753_v40 }
  0xaa   : > { %1866 = vmatmul.mubr.msk.bf16.vlgmr.msra.gmra.mxu1 %vm449_vm3, %v2248_v5  ;;  %1808 = vmatmul.mubr.msk.bf16.vlgmr.msra.gmra.mxu0 %vm449_vm3, %v2248_v5  ;;  %v766_v50 = vsel %vm453_vm2, %v759_v45, 0 }
  0xab   : > { %1870 = vmatpush3.bf16.msra.mxu1 %v664_v39  ;;  %1871 = vmatprep.mubr.msk.bf16.mxu1 %vm2097_vm0, %v2095_v18 }
  0xac   : > { %v757_v43 = vpop.permute.xlu1 %756  ;;  %1875 = vmatprep.subr.bf16.mxu1 %v2095_v18  ;;  %681 = vmatpush1.bf16.msra.mxu0 %v658_v41  ;;  %v755_v44 = vpop.permute.xlu0 %754 }
  0xad   : > { %698 = vmatprep.mubr.bf16.mxu0 %v2096_v19  ;;  %v760_v46 = vsel %vm758_vm5, %v753_v40, %v755_v44  ;;  %v761_v47 = vsel %vm758_vm5, %v755_v44, %v757_v43 }
  0xae   : > { %v772_v48 = vsel %vm453_vm2, %v761_v47, 0  ;;  %1813 = vmatprep.subr.msk.bf16.mxu0 %vm453_vm2, %v760_v46 }
  0xb0   : > { %v861_v49 = vpop.permute.xlu1 %860  ;;  %v859_v51 = vpop.permute.xlu0 %858 }
  0xb1   : > { %v867_v54 = vsel %vm866_vm6, %v859_v51, %v861_v49 }
  0xb2   : > { %1872 = vmatmul.mubr.msk.bf16.vlgmr.msra.gmra.mxu1 %vm449_vm3, %v2258_v7  ;;  %1811 = vmatmul.mubr.msk.bf16.vlgmr.msra.gmra.mxu0 %vm449_vm3, %v2258_v7  ;;  %v874_v59 = vsel %vm453_vm2, %v867_v54, 0 }
  0xb3   : > { %1876 = vmatpush3.bf16.msra.mxu1 %v772_v48  ;;  %1877 = vmatprep.mubr.msk.bf16.mxu1 %vm2097_vm0, %v2095_v18 }
  0xb4   : > { %v865_v52 = vpop.permute.xlu1 %864  ;;  %1881 = vmatprep.subr.bf16.mxu1 %v2095_v18  ;;  %789 = vmatpush1.bf16.msra.mxu0 %v766_v50  ;;  %v863_v53 = vpop.permute.xlu0 %862 }
  0xb5   : > { %806 = vmatprep.mubr.bf16.mxu0 %v2096_v19  ;;  %v868_v55 = vsel %vm866_vm6, %v861_v49, %v863_v53  ;;  %v869_v56 = vsel %vm866_vm6, %v863_v53, %v865_v52 }
  0xb6   : > { %v880_v57 = vsel %vm453_vm2, %v869_v56, 0  ;;  %1816 = vmatprep.subr.msk.bf16.mxu0 %vm453_vm2, %v868_v55 }
  0xb8   : > { %v969_v58 = vpop.permute.xlu1 %968  ;;  %v967_v60 = vpop.permute.xlu0 %966 }
  0xb9   : > { %v975_v63 = vsel %vm974_vm7, %v967_v60, %v969_v58 }
  0xba   : > { %1878 = vmatmul.mubr.msk.bf16.vlgmr.msra.gmra.mxu1 %vm449_vm3, %v2263_v8  ;;  %1814 = vmatmul.mubr.msk.bf16.vlgmr.msra.gmra.mxu0 %vm449_vm3, %v2263_v8  ;;  %v982_v14 = vsel %vm453_vm2, %v975_v63, 0 }
  0xbb   : > { %1882 = vmatpush3.bf16.msra.mxu1 %v880_v57  ;;  %1883 = vmatprep.mubr.msk.bf16.mxu1 %vm2097_vm0, %v2095_v18 }
  0xbc   : > { %v973_v61 = vpop.permute.xlu1 %972  ;;  %1887 = vmatprep.subr.bf16.mxu1 %v2095_v18  ;;  %897 = vmatpush1.bf16.msra.mxu0 %v874_v59  ;;  %v971_v62 = vpop.permute.xlu0 %970 }
  0xbd   : > { %914 = vmatprep.mubr.bf16.mxu0 %v2096_v19  ;;  %v976_v1 = vsel %vm974_vm7, %v969_v58, %v971_v62  ;;  %v977_v5 = vsel %vm974_vm7, %v971_v62, %v973_v61 }
  0xbe   : > { %v988_v6 = vsel %vm453_vm2, %v977_v5, 0  ;;  %1819 = vmatprep.subr.msk.bf16.mxu0 %vm453_vm2, %v976_v1 }
  0xc0   : > { %v1077_v7 = vpop.permute.xlu1 %1076  ;;  %v1075_v8 = vpop.permute.xlu0 %1074 }
  0xc1   : > { %v1083_v17 = vsel %vm1082_vm8, %v1075_v8, %v1077_v7 }
  0xc2   : > { %1884 = vmatmul.mubr.msk.bf16.vlgmr.msra.gmra.mxu1 %vm449_vm3, %v2268_v9  ;;  %1817 = vmatmul.mubr.msk.bf16.vlgmr.msra.gmra.mxu0 %vm449_vm3, %v2268_v9  ;;  %v1090_v24 = vsel %vm453_vm2, %v1083_v17, 0 }
  0xc3   : > { %1888 = vmatpush3.bf16.msra.mxu1 %v988_v6  ;;  %1889 = vmatprep.mubr.msk.bf16.mxu1 %vm2097_vm0, %v2095_v18 }
  0xc4   : > { %v1081_v15 = vpop.permute.xlu1 %1080  ;;  %1893 = vmatprep.subr.bf16.mxu1 %v2095_v18  ;;  %1005 = vmatpush1.bf16.msra.mxu0 %v982_v14  ;;  %v1079_v16 = vpop.permute.xlu0 %1078 }
  0xc5   : > { %1022 = vmatprep.mubr.bf16.mxu0 %v2096_v19  ;;  %v1084_v20 = vsel %vm1082_vm8, %v1077_v7, %v1079_v16  ;;  %v1085_v21 = vsel %vm1082_vm8, %v1079_v16, %v1081_v15 }
  0xc6   : > { %v1096_v22 = vsel %vm453_vm2, %v1085_v21, 0  ;;  %1822 = vmatprep.subr.msk.bf16.mxu0 %vm453_vm2, %v1084_v20 }
  0xc8   : > { %v1185_v23 = vpop.permute.xlu1 %1184  ;;  %v1183_v9 = vpop.permute.xlu0 %1182 }
  0xc9   : > { %v1191_v27 = vsel %vm1190_vm9, %v1183_v9, %v1185_v23 }
  0xca   : > { %1890 = vmatmul.mubr.msk.bf16.vlgmr.msra.gmra.mxu1 %vm449_vm3, %v2280_v10  ;;  %1820 = vmatmul.mubr.msk.bf16.vlgmr.msra.gmra.mxu0 %vm449_vm3, %v2280_v10  ;;  %v1198_v32 = vsel %vm453_vm2, %v1191_v27, 0 }
  0xcb   : > { %1894 = vmatpush3.bf16.msra.mxu1 %v1096_v22  ;;  %1895 = vmatprep.mubr.msk.bf16.mxu1 %vm2097_vm0, %v2095_v18 }
  0xcc   : > { %v1189_v25 = vpop.permute.xlu1 %1188  ;;  %1899 = vmatprep.subr.bf16.mxu1 %v2095_v18  ;;  %1113 = vmatpush1.bf16.msra.mxu0 %v1090_v24  ;;  %v1187_v26 = vpop.permute.xlu0 %1186 }
  0xcd   : > { %1130 = vmatprep.mubr.bf16.mxu0 %v2096_v19  ;;  %v1192_v28 = vsel %vm1190_vm9, %v1185_v23, %v1187_v26  ;;  %v1193_v29 = vsel %vm1190_vm9, %v1187_v26, %v1189_v25 }
  0xce   : > { %v1204_v30 = vsel %vm453_vm2, %v1193_v29, 0  ;;  %1825 = vmatprep.subr.msk.bf16.mxu0 %vm453_vm2, %v1192_v28 }
  0xd0   : > { %v1293_v31 = vpop.permute.xlu1 %1292  ;;  %v1291_v10 = vpop.permute.xlu0 %1290 }
  0xd1   : > { %v1299_v35 = vsel %vm1298_vm10, %v1291_v10, %v1293_v31 }
  0xd2   : > { %1896 = vmatmul.mubr.msk.bf16.vlgmr.msra.gmra.mxu1 %vm449_vm3, %v2285_v11  ;;  %1823 = vmatmul.mubr.msk.bf16.vlgmr.msra.gmra.mxu0 %vm449_vm3, %v2285_v11  ;;  %v1306_v39 = vsel %vm453_vm2, %v1299_v35, 0 }
  0xd3   : > { %1900 = vmatpush3.bf16.msra.mxu1 %v1204_v30  ;;  %1901 = vmatprep.mubr.msk.bf16.mxu1 %vm2097_vm0, %v2095_v18 }
  0xd4   : > { %v1297_v33 = vpop.permute.xlu1 %1296  ;;  %1905 = vmatprep.subr.bf16.mxu1 %v2095_v18  ;;  %1221 = vmatpush1.bf16.msra.mxu0 %v1198_v32  ;;  %v1295_v34 = vpop.permute.xlu0 %1294 }
  0xd5   : > { %1238 = vmatprep.mubr.bf16.mxu0 %v2096_v19  ;;  %v1300_v36 = vsel %vm1298_vm10, %v1293_v31, %v1295_v34  ;;  %v1301_v37 = vsel %vm1298_vm10, %v1295_v34, %v1297_v33 }
  0xd6   : > { %v1312_v38 = vsel %vm453_vm2, %v1301_v37, 0  ;;  %1828 = vmatprep.subr.msk.bf16.mxu0 %vm453_vm2, %v1300_v36 }
  0xda   : > { %1902 = vmatmul.mubr.msk.bf16.vlgmr.msra.gmra.mxu1 %vm449_vm3, %v2295_v12  ;;  %1826 = vmatmul.mubr.msk.bf16.vlgmr.msra.gmra.mxu0 %vm449_vm3, %v2295_v12 }
  0xdb   : > { %1906 = vmatpush3.bf16.msra.mxu1 %v1312_v38  ;;  %1907 = vmatprep.mubr.msk.bf16.mxu1 %vm2097_vm0, %v2095_v18 }
  0xdc   : > { %1329 = vmatpush1.bf16.msra.mxu0 %v1306_v39  ;;  %1346 = vmatprep.mubr.bf16.mxu0 %v2096_v19 }
  0xe2   : > { %1908 = vmatmul.mubr.msk.bf16.vlgmr.msra.gmra.mxu1 %vm449_vm3, %v2300_v13  ;;  %1829 = vmatmul.mubr.msk.bf16.vlgmr.msra.gmra.mxu0 %vm449_vm3, %v2300_v13 }
 0x162   : > { %v538_v11 = vpop.f32.mrf.mxu1  ;;  %v497_v40 = vpop.f32.mrf.mxu0 }
 0x164   : > { %v1861_v41 = vpop.f32.mrf.mxu1  ;;  %v499_v42 = vpop.f32.mrf.mxu0 }
 0x166   : > { %v541_v43 = vpop.f32.mrf.mxu1  ;;  %v501_v44 = vpop.f32.mrf.mxu0 }
 0x167   : > { %v1407_v43 = vlaneseq }
 0x168   : > { %v1862_v45 = vpop.f32.mrf.mxu1  ;;  %v502_v18 = vpop.f32.mrf.mxu0 }
 0x169   : > { %vm2482_vm12 = vcmp.lt.s32.totalorder %v1407_v43, 384 }
 0x16a   : > { %v636_v46 = vpop.f32.mrf.mxu1  ;;  %v595_v47 = vpop.f32.mrf.mxu0 }
 0x16b   : > { %v637_v32 = vadd.f32 %v636_v46, %v538_v11  ;;  %v596_v34 = vadd.f32 %v595_v47, %v497_v40  ;;  %v2437_v46 = vshrl.u32 %v1407_v43, 7 }
 0x16c   : > { %v1867_v12 = vpop.f32.mrf.mxu1  ;;  %v597_v48 = vpop.f32.mrf.mxu0 }
 0x16d   : > { %v598_v38 = vadd.f32 %v597_v48, %v499_v42 }
 0x16e   : > { %v639_v49 = vpop.f32.mrf.mxu1  ;;  %v599_v19 = vpop.f32.mrf.mxu0 }
 0x170   : > { %v1868_v50 = vpop.f32.mrf.mxu1  ;;  %v600_v51 = vpop.f32.mrf.mxu0 }
 0x172   : > { %v741_v52 = vpop.f32.mrf.mxu1  ;;  %v700_v53 = vpop.f32.mrf.mxu0 }
 0x173   : > { %v749_v35 = vadd.f32 %v741_v52, %v637_v32  ;;  %v747_v39 = vadd.f32 %v700_v53, %v596_v34 }
 0x174   : > { %v1873_v54 = vpop.f32.mrf.mxu1  ;;  %v702_v13 = vpop.f32.mrf.mxu0 }
 0x175   : > { %v748_v18 = vadd.f32 %v702_v13, %v598_v38 }
 0x176   : > { %v744_v55 = vpop.f32.mrf.mxu1  ;;  %v704_v56 = vpop.f32.mrf.mxu0 }
 0x178   : > { %v1874_v57 = vpop.f32.mrf.mxu1  ;;  %v705_v58 = vpop.f32.mrf.mxu0 }
 0x179   : > { %v1409_v58 = vsub.s32 0, %v2437_v46 }
 0x17a   : > { %v849_v59 = vpop.f32.mrf.mxu1  ;;  %v808_v60 = vpop.f32.mrf.mxu0 }
 0x17b   : > { %v857_v41 = vadd.f32 %v849_v59, %v749_v35  ;;  %v855_v12 = vadd.f32 %v808_v60, %v747_v39 }
 0x17c   : > { %v1879_v61 = vpop.f32.mrf.mxu1  ;;  %v810_v62 = vpop.f32.mrf.mxu0 }
 0x17d   : > { %v856_v51 = vadd.f32 %v810_v62, %v748_v18  ;;  %v1417_v61 = vsub.s32 2, %v2437_v46 }
 0x17e   : > { %v852_v63 = vpop.f32.mrf.mxu1  ;;  %v812_v1 = vpop.f32.mrf.mxu0 }
 0x180   : > { %v1880_v5 = vpop.f32.mrf.mxu1  ;;  %v813_v6 = vpop.f32.mrf.mxu0 }
 0x181   : > { %v1401_v5 = vpop.permute.xlu0 %1400  ;;  %v1413_v6 = vsub.s32 1, %v2437_v46 }
 0x182   : > { %v957_v7 = vpop.f32.mrf.mxu1  ;;  %v916_v14 = vpop.f32.mrf.mxu0 }
 0x183   : > { %v965_v49 = vadd.f32 %v957_v7, %v857_v41  ;;  %v963_v54 = vadd.f32 %v916_v14, %v855_v12 }
 0x184   : > { %v1885_v8 = vpop.f32.mrf.mxu1  ;;  %v918_v15 = vpop.f32.mrf.mxu0 }
 0x185   : > { %v964_v52 = vadd.f32 %v918_v15, %v856_v51 }
 0x186   : > { %v960_v16 = vpop.f32.mrf.mxu1  ;;  %v920_v17 = vpop.f32.mrf.mxu0 }
 0x187   : > { %v2445_v16 = vrot.slane %v2221_v0, %v1409_v58 }
 0x188   : > { %v1886_v20 = vpop.f32.mrf.mxu1  ;;  %v921_v21 = vpop.f32.mrf.mxu0 }
 0x189   : > { %v2450_v21 = vrot.slane %v2221_v0, %v1417_v61 }
 0x18a   : > { %v1065_v22 = vpop.f32.mrf.mxu1  ;;  %v1024_v23 = vpop.f32.mrf.mxu0 }
 0x18b   : > { %v1073_v11 = vadd.f32 %v1065_v22, %v965_v49  ;;  %v1071_v42 = vadd.f32 %v1024_v23, %v963_v54 }
 0x18c   : > { %v1891_v24 = vpop.f32.mrf.mxu1  ;;  %v1026_v9 = vpop.f32.mrf.mxu0 }
 0x18d   : > { %v1072_v56 = vadd.f32 %v1026_v9, %v964_v52  ;;  %v2455_v9 = vrot.slane %v2221_v0, %v1413_v6 }
 0x18e   : > { %v1068_v25 = vpop.f32.mrf.mxu1  ;;  %v1028_v26 = vpop.f32.mrf.mxu0 }
 0x190   : > { %v1892_v27 = vpop.f32.mrf.mxu1  ;;  %v1029_v28 = vpop.f32.mrf.mxu0 }
 0x192   : > { %v1173_v29 = vpop.f32.mrf.mxu1  ;;  %v1132_v30 = vpop.f32.mrf.mxu0 }
 0x193   : > { %v1181_v48 = vadd.f32 %v1173_v29, %v1073_v11  ;;  %v1179_v57 = vadd.f32 %v1132_v30, %v1071_v42 }
 0x194   : > { %v1897_v31 = vpop.f32.mrf.mxu1  ;;  %v1134_v10 = vpop.f32.mrf.mxu0 }
 0x195   : > { %v1180_v62 = vadd.f32 %v1134_v10, %v1072_v56 }
 0x196   : > { %v1176_v33 = vpop.f32.mrf.mxu1  ;;  %v1136_v36 = vpop.f32.mrf.mxu0 }
 0x198   : > { %v1898_v37 = vpop.f32.mrf.mxu1  ;;  %v1137_v44 = vpop.f32.mrf.mxu0 }
 0x19a   : > { %v1281_v45 = vpop.f32.mrf.mxu1  ;;  %v1240_v19 = vpop.f32.mrf.mxu0 }
 0x19b   : > { %v1289_v13 = vadd.f32 %v1281_v45, %v1181_v48  ;;  %v1287_v63 = vadd.f32 %v1240_v19, %v1179_v57 }
 0x19c   : > { %v1903_v50 = vpop.f32.mrf.mxu1  ;;  %v1242_v40 = vpop.f32.mrf.mxu0 }
 0x19d   : > { %v1288_v8 = vadd.f32 %v1242_v40, %v1180_v62 }
 0x19e   : > { %v1284_v47 = vpop.f32.mrf.mxu1  ;;  %v1244_v53 = vpop.f32.mrf.mxu0 }
 0x1a0   : > { %v1904_v55 = vpop.f32.mrf.mxu1  ;;  %v1245_v59 = vpop.f32.mrf.mxu0 }
 0x1a2   : > { %v1389_v60 = vpop.f32.mrf.mxu1  ;;  %v1348_v7 = vpop.f32.mrf.mxu0 }
 0x1a3   : > { %v1397_v1 = vadd.f32 %v1389_v60, %v1289_v13  ;;  %v1395_v15 = vadd.f32 %v1348_v7, %v1287_v63 }
 0x1a4   : > { %v1909_v14 = vpop.f32.mrf.mxu1  ;;  %v1350_v17 = vpop.f32.mrf.mxu0 }
 0x1a5   : > { %v1403_v22 = vadd.f32 %v1401_v5, %v1395_v15  ;;  %v1405_v23 = vadd.f32 %v1401_v5, %v1397_v1  ;;  %v1396_v24 = vadd.f32 %v1350_v17, %v1288_v8 }
 0x1a6   : > { %v1392_v20 = vpop.f32.mrf.mxu1  ;;  %v1352_v25 = vpop.f32.mrf.mxu0 }
 0x1a7   : > { %v1422_v27 = vmul.f32 %v2445_v16, %v1403_v22  ;;  %v1404_v28 = vadd.f32 %v1401_v5, %v1396_v24  ;;  %v1424_v31 = vmul.f32 %v2450_v21, %v1405_v23 }
 0x1a8   : > { %v1910_v26 = vpop.f32.mrf.mxu1  ;;  %v1353_v29 = vpop.f32.mrf.mxu0 }
 0x1a9   : > { %v1423_v30 = vmul.f32 %v2455_v9, %v1404_v28  ;;  %v1426_v32 = vsel %vm1425_vm11, %v1422_v27, 0.0  ;;  %v1429_v34 = vsel %vm1425_vm11, %v1424_v31, 0.0 }
 0x1ab   : > { %v1427_v10 = vsel %vm1425_vm11, %v1423_v30, 0.0 }
 0x1ac   : > { %v1428_v33 = vadd.f32 %v1427_v10, %v1426_v32 }
 0x1ae   : > { %v1430_v0 = vadd.f32 %v1429_v34, %v1428_v33 }
 0x1b0   : > { %1431 = vadd.xlane.f32.xlu1 %v1430_v0 }
 0x1c1   : > { %1476 = vperm.xlu1 %1980, %v2232_v2  }
 0x1c5   : > { %1495 = vperm.xlu1 %1980, %v2243_v4  }
 0x239   : > { %v1432_v35 = vpop.xlane.xlu1 %1431 }
 0x23a   : > { %v1433_v36 = vrot.slane %v1432_v35, 4 }
 0x23c   : > { %v1434_v37 = vadd.f32 %v1433_v36, %v1432_v35 }
 0x23d   : > { %v1477_v7 = vpop.permute.xlu1 %1476 }
 0x23e   : > { %v1435_v38 = vrot.slane %v1434_v37, 2 }
 0x240   : > { %v1436_v39 = vadd.f32 %v1435_v38, %v1434_v37  ;;  %v2105_v38 = vmov 1966171168  }
 0x241   : > { %v1496_v27 = vpop.permute.xlu1 %1495 }
 0x242   : > { %v1437_v41 = vrot.slane %v1436_v39, 1 }
 0x244   : > { %v1438_v44 = vadd.f32 %v1437_v41, %v1436_v39  ;;  %v1531_v39 = vunpack.c.l.s4 %v2105_v38 }
 0x246   : > { %1913 = vpush %v1438_v44 }
 0x277   : > { %s1914_s4 = spop %1913 }
 0x278   : > { %s1440_s19 = smul.f32 0.0009765625, %s1914_s4 }
 0x27a   : > { %v1441_v45 = vstv %s1440_s19 }
 0x27b   : > { %v1442_v18 = vsub.f32 %v1403_v22, %v1441_v45  ;;  %v1443_v12 = vsub.f32 %v1404_v28, %v1441_v45  ;;  %v1444_v49 = vsub.f32 %v1405_v23, %v1441_v45 }
 0x27d   : > { %v1445_v19 = vmul.f32 %v1442_v18, %v1442_v18  ;;  %v1446_v50 = vmul.f32 %v1443_v12, %v1443_v12  ;;  %v1447_v51 = vmul.f32 %v1444_v49, %v1444_v49 }
 0x27f   : > { %v1448_v2 = vmul.f32 %v1445_v19, %v2445_v16  ;;  %v1449_v4 = vmul.f32 %v1446_v50, %v2455_v9  ;;  %v1450_v54 = vmul.f32 %v1447_v51, %v2450_v21  ;;  %v1532_v19 = vunpack.c.0.s8 %v1531_v39 }
 0x281   : > { %v1451_v11 = vsel %vm1425_vm11, %v1448_v2, 0.0  ;;  %v1452_v40 = vsel %vm1425_vm11, %v1449_v4, 0.0  ;;  %v1454_v52 = vsel %vm1425_vm11, %v1450_v54, 0.0  ;;  %v1522_v4 = vstv %s2275_s13 }
 0x282   : > { %v1453_v47 = vadd.f32 %v1452_v40, %v1451_v11 }
 0x284   : > { %v1455_v42 = vadd.f32 %v1454_v52, %v1453_v47  ;;  %v2477_v47 = vsub.s32 %v1532_v19, %v2437_v46 }
 0x286   : > { %1456 = vadd.xlane.f32.xlu0 %v1455_v42 }
 0x29c   : > { %1484 = vperm.xlu0 %1979, %v2237_v3  }
 0x30f   : > { %v1457_v48 = vpop.xlane.xlu0 %1456 }
 0x310   : > { %v1458_v53 = vrot.slane %v1457_v48, 4 }
 0x312   : > { %v1459_v55 = vadd.f32 %v1458_v53, %v1457_v48 }
 0x314   : > { %v1460_v56 = vrot.slane %v1459_v55, 2 }
 0x316   : > { %v1461_v57 = vadd.f32 %v1460_v56, %v1459_v55 }
 0x317   : > { %v1485_v17 = vpop.permute.xlu0 %1484 }
 0x318   : > { %v1462_v13 = vrot.slane %v1461_v57, 1 }
 0x31a   : > { %v1463_v59 = vadd.f32 %v1462_v13, %v1461_v57 }
 0x31c   : > { %1915 = vpush %v1463_v59 }
 0x34d   : > { %s1916_s12 = spop %1915 }
 0x34e   : > { %s1465_s2 = smul.f32 0.0009765625, %s1916_s12 }
 0x350   : > { %s1466_s0 = sadd.f32 1e-05, %s1465_s2 }
 0x352   : > { %v1467_v60 = vstv %s1466_s0 }
 0x353   : > { %1988 = vrsqrt.f32 %v1467_v60 }
 0x360   : > { %v1989_v62 = vpop.eup %1988 }
 0x361   : > { %1917 = vpush %v1989_v62 }
 0x392   : > { %s1918_s11 = spop %1917 }
 0x393   : > { %v1470_v63 = vstv %s1918_s11 }
 0x394   : > { %v1471_v1 = vmul.f32 %v1470_v63, %v1442_v18  ;;  %v1472_v5 = vmul.f32 %v1470_v63, %v1443_v12  ;;  %v1473_v3 = vmul.f32 %v1470_v63, %v1444_v49 }
 0x396   : > { %v1479_v14 = vmul.f32 %v1477_v7, %v1471_v1  ;;  %v1480_v8 = vmul.f32 %v1477_v7, %v1472_v5  ;;  %v1481_v15 = vmul.f32 %v1477_v7, %v1473_v3 }
 0x398   : > { %v1487_v20 = vadd.f32 %v1485_v17, %v1479_v14  ;;  %v1488_v22 = vadd.f32 %v1485_v17, %v1480_v8  ;;  %v1489_v23 = vadd.f32 %v1485_v17, %v1481_v15 }
 0x39a   : > { %v1490_v24 = vmax.f32 %v1487_v20, 0.0  ;;  %v1491_v25 = vmax.f32 %v1488_v22, 0.0  ;;  %v1492_v26 = vmax.f32 %v1489_v23, 0.0 }
 0x39c   : > { %v1498_v28 = vmul.f32 %v1496_v27, %v1490_v24  ;;  %v1499_v29 = vmul.f32 %v1496_v27, %v1491_v25  ;;  %v1500_v30 = vmul.f32 %v1496_v27, %v1492_v26 }
 0x39e   : > { %v1501_v31 = vsel %vm1425_vm11, %v1498_v28, 0.0  ;;  %v1508_v32 = vsel %vm1425_vm11, %v1499_v29, 0.0  ;;  %v1515_v10 = vsel %vm1425_vm11, %v1500_v30, 0.0 }
 0x39f   : > { %v1502_v33 = vrot.slane %v1501_v31, 4  ;;  %v1509_v34 = vrot.slane %v1508_v32, 4  ;;  %v1516_v0 = vrot.slane %v1515_v10, 4 }
 0x3a1   : > { %v1503_v35 = vadd.f32 %v1502_v33, %v1501_v31  ;;  %v1510_v36 = vadd.f32 %v1509_v34, %v1508_v32  ;;  %v1517_v37 = vadd.f32 %v1516_v0, %v1515_v10 }
 0x3a3   : > { %v1504_v41 = vrot.slane %v1503_v35, 2  ;;  %v1511_v44 = vrot.slane %v1510_v36, 2  ;;  %v1518_v45 = vrot.slane %v1517_v37, 2 }
 0x3a5   : > { %v1505_v18 = vadd.f32 %v1504_v41, %v1503_v35  ;;  %v1512_v12 = vadd.f32 %v1511_v44, %v1510_v36  ;;  %v1519_v49 = vadd.f32 %v1518_v45, %v1517_v37 }
 0x3a7   : > { %v1506_v50 = vrot.slane %v1505_v18, 1  ;;  %v1513_v51 = vrot.slane %v1512_v12, 1  ;;  %v1520_v2 = vrot.slane %v1519_v49, 1 }
 0x3a9   : > { %v1507_v54 = vadd.f32 %v1506_v50, %v1505_v18  ;;  %v1514_v11 = vadd.f32 %v1513_v51, %v1512_v12  ;;  %v1521_v40 = vadd.f32 %v1520_v2, %v1519_v49 }
 0x3ab   : > { %v1523_v52 = vadd.f32 %v1522_v4, %v1507_v54  ;;  %v1524_v42 = vadd.f32 %v1522_v4, %v1514_v11  ;;  %v1525_v48 = vadd.f32 %v1522_v4, %v1521_v40 }
 0x3ad   : > { %v1529_v53 = vcombine.low %v1523_v52, %v1524_v42  ;;  %v1831_v55 = vmul.f32 -1.442695, %v1523_v52  ;;  %v1832_v56 = vmul.f32 -1.442695, %v1524_v42  ;;  %v1833_v57 = vmul.f32 -1.442695, %v1525_v48 }
 0x3ae   : > { %v1543_v59 = vrot.slane %v1525_v48, %v2477_v47 }
 0x3af   : > { %v1536_v13 = vrot.slane %v1529_v53, %v2477_v47  ;;  %1990 = vpow2.f32 %v1831_v55 }
 0x3b0   : > { %1992 = vpow2.f32 %v1832_v56 }
 0x3b1   : > { %1994 = vpow2.f32 %v1833_v57  ;;  %v1544_v60 = vcombine.low %v1536_v13, %v1543_v59 }
 0x3b3   : > { %v1551_v63 = vrot.slane %v1544_v60, %v2477_v47 }
 0x3b5   : > { %1557 = vst.msk [vmem:[%s2304_s14] sm:$0x7] %vm2482_vm12, %v1551_v63 }
 0x3bc   : > { %v1991_v1 = vpop.eup %1990 }
 0x3bd   : > { %v1993_v5 = vpop.eup %1992  ;;  %v1567_v3 = vadd.f32 1.0, %v1991_v1 }
 0x3be   : > { %v1995_v7 = vpop.eup %1994  ;;  %v1568_v14 = vadd.f32 1.0, %v1993_v5 }
 0x3bf   : > { %v1569_v8 = vadd.f32 1.0, %v1995_v7  ;;  %1996 = vrcp.f32 %v1567_v3 }
 0x3c0   : > { %1998 = vrcp.f32 %v1568_v14 }
 0x3c1   : > { %2000 = vrcp.f32 %v1569_v8 }
 0x3cc   : > { %v1997_v15 = vpop.eup %1996 }
 0x3cd   : > { %v1999_v43 = vpop.eup %1998  ;;  %v1576_v17 = vmul.f32 %v1997_v15, %v2445_v16  ;;  %v1599_v16 = vld [vmem:[%s2290_s29] sm:$0x7] }
 0x3ce   : > { %v2001_v20 = vpop.eup %2000  ;;  %v1577_v22 = vmul.f32 %v1999_v43, %v2455_v9  ;;  %v1608_v9 = vrot.slane %v1599_v16, %v1413_v6  ;;  %v1612_v0 = vrot.slane %v1599_v16, %v1417_v61 }
 0x3cf   : > { %v1578_v23 = vmul.f32 %v2001_v20, %v2450_v21  ;;  %v1580_v24 = vsel %vm1579_vm13, %v1576_v17, 0.0  ;;  %v1604_v21 = vrot.slane %v1599_v16, %v1409_v58 }
 0x3d0   : > { %v1581_v25 = vsel %vm1579_vm13, %v1577_v22, 0.0 }
 0x3d1   : > { %v1582_v26 = vadd.f32 %v1581_v25, %v1580_v24  ;;  %v1583_v27 = vsel %vm1579_vm13, %v1578_v23, 0.0 }
 0x3d3   : > { %v1584_v28 = vadd.f32 %v1583_v27, %v1582_v26 }
 0x3d5   : > { %1585 = vadd.xlane.f32.xlu1 %v1584_v28 }
 0x45e   : > { %v1586_v29 = vpop.xlane.xlu1 %1585 }
 0x45f   : > { %v1587_v30 = vrot.slane %v1586_v29, 4 }
 0x461   : > { %v1588_v31 = vadd.f32 %v1587_v30, %v1586_v29 }
 0x463   : > { %v1589_v32 = vrot.slane %v1588_v31, 2 }
 0x465   : > { %v1590_v10 = vadd.f32 %v1589_v32, %v1588_v31 }
 0x467   : > { %v1591_v33 = vrot.slane %v1590_v10, 1 }
 0x469   : > { %v1592_v34 = vadd.f32 %v1591_v33, %v1590_v10 }
 0x46b   : > { %1919 = vpush %v1592_v34 }
 0x49c   : > { %s1920_s13 = spop %1919 }
 0x49d   : > { %s1594_s21 = smul.f32 0.00390625, %s1920_s13 }
 0x49f   : > { %v1595_v35 = vstv %s1594_s21 }
 0x4a0   : > { %vm1596_vm14 = vcmp.gt.f32.partialorder %v1997_v15, %v1595_v35  ;;  %vm1597_vm15 = vcmp.gt.f32.partialorder %v1999_v43, %v1595_v35  ;;  %vm1598_vm0 = vcmp.gt.f32.partialorder %v2001_v20, %v1595_v35 }
 0x4a1   : > { %v1616_v36 = vsel %vm1596_vm14, %v1604_v21, 0.0  ;;  %v1617_v37 = vsel %vm1597_vm15, %v1608_v9, 0.0  ;;  %v1618_v38 = vsel %vm1598_vm0, %v1612_v0, 0.0 }
 0x4a2   : > { %v1622_v39 = vcombine.low %v1616_v36, %v1617_v37  ;;  %v1636_v44 = vrot.slane %v1618_v38, %v2477_v47 }
 0x4a4   : > { %v1629_v41 = vrot.slane %v1622_v39, %v2477_v47 }
 0x4a6   : > { %v1637_v45 = vcombine.low %v1629_v41, %v1636_v44 }
 0x4a8   : > { %v1644_v58 = vrot.slane %v1637_v45, %v2477_v47 }
 0x4aa   : > { %1646 = vst.msk [vmem:[%s2302_s5] sm:$0x7] %vm2482_vm12, %v1644_v58 }
 0x4ab PF: > { %s1921_s29 = smul.u32 48, %s2187_s8  ;;  %s1667_s22 = sshll.u32 %s2302_s5, 4  ;;  %s1668_s22 = int_to_ptr.vmem [resolvable:$true] %s1667_s22 }
 0x4ac   : > { %s1648_s4 = scalar_lea.sflag [#allocation4], %s2215_s26  ;;  %s2002_s19 = scalar_lea.vmem %s1668_s22, 48 }
 0x4ad   : > { %s1665_s30 = scalar_lea.hbm %s2571_s9, %s1921_s29  ;;  %p2003_p12 = scmp.ne.s32.totalorder %s1668_s22, %s2002_s19 }
 0x4ae   : > { %s2106_s12 = smov [#allocation3]  }
 0x4af   : > { %p2004_p13 = pnand %p2003_p12, %p2204_p5  ;;  %s2006_s2 = sshll.u32 %s2106_s12, 4  ;;  %s2007_s2 = int_to_ptr.vmem [resolvable:$false] %s2006_s2 }
 0x4b0   : > { %s2008_s0 = scalar_lea.vmem %s2007_s2, 96  ;;  %p2009_p1 = scmp.lt.s32.totalorder %s1668_s22, %s2007_s2 }
 0x4b1   : > { %p2005_p0 = pneg %p2004_p13  ;;  %p2010_p2 = scmp.lt.s32.totalorder %s2008_s0, %s2002_s19 }
 0x4b3   : > { %p2011_p3 = por %p2010_p2, %p2009_p1 }
 0x4b5   : > { %p2012_p4 = pnand %p2011_p3, %p2005_p0 }
 0x4b7   : > { %2015 = shalt.err (!%p2012_p4)
}
 0x4b8   : > { %s2016_s5 = scalar_lea.hbm %s1665_s30, 48  ;;  %s2020_s21 = scalar_lea.hbm %s2571_s9, 96 }
 0x4b9   : > { %p2017_p7 = scmp.ne.s32.totalorder %s1665_s30, %s2016_s5  ;;  %p2021_p10 = scmp.lt.s32.totalorder %s1665_s30, %s2571_s9 }
 0x4ba   : > { %p2022_p11 = scmp.lt.s32.totalorder %s2020_s21, %s2016_s5 }
 0x4bb   : > { %p2018_p8 = pnand %p2017_p7, %p2204_p5 }
 0x4bc   : > { %p2023_p12 = por %p2022_p11, %p2021_p10 }
 0x4bd   : > { %p2019_p9 = pneg %p2018_p8 }
 0x4bf   : > { %p2024_p13 = pnand %p2023_p12, %p2019_p9 }
 0x4c1   : > { %2027 = shalt.err (!%p2024_p13)
}
 0x4c2   : > { %1923 = dma.vmem_to_hbm [thread:$0]  (%p2204_p5), %s1668_s22, 48, %s1665_s30, %s1648_s4  }
 0x4c3   : > { %s1679_s2 = scalar_lea.hbm %s2572_s10, %s1921_s29  ;;  %s1681_s0 = sshll.u32 %s2304_s14, 4  ;;  %s1682_s0 = int_to_ptr.vmem [resolvable:$true] %s1681_s0 }
 0x4c4   : > { %s1653_s11 = scalar_lea.sflag [#allocation6], %s2215_s26  ;;  %s2028_s13 = scalar_lea.vmem %s1682_s0, 48 }
 0x4c5   : > { %p2029_p0 = scmp.ne.s32.totalorder %s1682_s0, %s2028_s13  ;;  %s2107_s5 = smov [#allocation5]  }
 0x4c6   : > { %s2032_s21 = sshll.u32 %s2107_s5, 4  ;;  %s2033_s21 = int_to_ptr.vmem [resolvable:$false] %s2032_s21 }
 0x4c7   : > { %p2030_p1 = pnand %p2029_p0, %p2204_p5  ;;  %s2034_s27 = scalar_lea.vmem %s2033_s21, 96 }
 0x4c8   : > { %p2035_p3 = scmp.lt.s32.totalorder %s1682_s0, %s2033_s21  ;;  %p2036_p4 = scmp.lt.s32.totalorder %s2034_s27, %s2028_s13 }
 0x4c9   : > { %p2031_p2 = pneg %p2030_p1 }
 0x4ca   : > { %p2037_p7 = por %p2036_p4, %p2035_p3 }
 0x4cc   : > { %p2038_p8 = pnand %p2037_p7, %p2031_p2 }
 0x4ce   : > { %2041 = shalt.err (!%p2038_p8)
}
 0x4cf   : > { %s2042_s8 = scalar_lea.hbm %s1679_s2, 48  ;;  %s2046_s29 = scalar_lea.hbm %s2572_s10, 96 }
 0x4d0   : > { %p2043_p9 = scmp.ne.s32.totalorder %s1679_s2, %s2042_s8  ;;  %p2047_p12 = scmp.lt.s32.totalorder %s1679_s2, %s2572_s10 }
 0x4d1   : > { %p2048_p13 = scmp.lt.s32.totalorder %s2046_s29, %s2042_s8 }
 0x4d2   : > { %p2044_p10 = pnand %p2043_p9, %p2204_p5 }
 0x4d3   : > { %p2049_p0 = por %p2048_p13, %p2047_p12 }
 0x4d4   : > { %p2045_p11 = pneg %p2044_p10 }
 0x4d6   : > { %p2050_p1 = pnand %p2049_p0, %p2045_p11 }
 0x4d8   : > { %2053 = shalt.err (!%p2050_p1)
}
 0x4d9   : > { %1924 = dma.vmem_to_hbm [thread:$0]  (%p2204_p5), %s1682_s0, 48, %s1679_s2, %s1653_s11  }
 0x4da PF: > { %p1934_p2 = scmp.ge.s32.totalorder %s2092_s18, 2  ;;  %s1693_s4 = sand.u32 1, %s2080_s15  }
 0x4db   : > { %s1694_s28 = scalar_lea.sflag [#allocation4], %s1693_s4 }
 0x4dc   : > { %p1928_p3 = pnand %p1934_p2, %p2208_p6 }
 0x4de   : > { %p1929_p4 = pneg %p1928_p3 }
 0x4e0   : > { %2071 = dma.done.wait (%p1929_p4), %s1694_s28, 48  }
 0x4e1   : > { %2073 = vsyncadd (%p1929_p4), %s1694_s28, 4294967248  ;;  %s1703_s19 = scalar_lea.sflag [#allocation6], %s1693_s4 }
 0x4e2   : > { %2075 = dma.done.wait (%p1929_p4), %s1703_s19, 48  }
 0x4e3   : > { %2077 = vsyncadd (%p1929_p4), %s1703_s19, 4294967248  ;;  %p25_p5 = scmp.ge.s32.totalorder %s2191_s20, 4   ;;  %s2585_s15 = smov %s2084_s16 }
 0x4e4   : > { %s2586_s16 = smov %s2088_s17  ;;  %s2587_s17 = smov %s2202_s23 }
 0x4e5   : > { %s2588_s18 = smov %s2191_s20  ;;  %27 = sbr.rel (!%p25_p5) target bundleno = 11 (0xb), region = 123 }
 0x4ea   :  { %1708 = vsyncpa [#allocation4], 1 }
 0x4eb   :  { %1710 = vsyncpa [#allocation4 + $0x1], 1 }
 0x4ec   :  { %1711 = vsyncpa [#allocation6], 1 }
 0x4ed   :  { %1713 = vsyncpa [#allocation6 + $0x1], 1 }

</bundles_post_ra>
